<compile_context>
chip_gen: v6e
topology: v6e:2x2x1
jax: 0.10.0
libtpu: 0.0.40
codegen_flags: <defaults>
</compile_context>

<pallas_src>
import jax
import jax.numpy as jnp
from jax.experimental import pallas as pl
from jax.experimental.pallas import tpu as pltpu


# ---------------------------------------------------------------------------
# Parameter construction (mirrors PositionalEncoding.__init__; fixed for odd E)
# ---------------------------------------------------------------------------
def make_positional_encoding(embed_size: int, max_len: int = 1000,
                             dtype=jnp.float32) -> jnp.ndarray:
    position = jnp.arange(0, max_len, dtype=jnp.float32)[:, None]            # (L, 1)
    div_term = jnp.exp(
        jnp.arange(0, embed_size, 2, dtype=jnp.float32)
        * -(jnp.log(jnp.float32(10000.0)) / embed_size)
    )
    n_odd = embed_size // 2  # number of odd-index columns (handles odd embed_size)
    enc = jnp.zeros((max_len, embed_size), dtype=jnp.float32)
    enc = enc.at[:, 0::2].set(jnp.sin(position * div_term))
    enc = enc.at[:, 1::2].set(jnp.cos(position * div_term)[:, :n_odd])
    return enc.astype(dtype)                                                  # (max_len, E)


def prepare_positional_encoding(encoding: jnp.ndarray, seq_len: int,
                                dtype) -> jnp.ndarray:
    """Slice to seq_len and cast once at init time -- hoists the extra HBM pass
    over the table out of the per-call path."""
    return encoding[:seq_len].astype(dtype)


# ---------------------------------------------------------------------------
# Kernels
# ---------------------------------------------------------------------------
def _add_pe_2d_kernel(x_ref, pe_ref, o_ref):
    # Batch dim squeezed away by the BlockSpec: plain 2-D elementwise add.
    o_ref[...] = x_ref[...] + pe_ref[...]


def _add_pe_batched_kernel(x_ref, pe_ref, o_ref):
    # x/o: (TB, rows, lane_w); pe: (rows, lane_w) resident for the whole grid.
    o_ref[...] = x_ref[...] + pe_ref[...][None, :, :]


# ---------------------------------------------------------------------------
# Tiling helpers
# ---------------------------------------------------------------------------
_TARGET_BLOCK_BYTES = 4 * 1024 * 1024   # ~4 MiB blocks: 85-86%-of-roofline plateau
_MIN_VMEM_BYTES = 32 * 1024 * 1024      # never request less than the v6e/v7x default
_MAX_VMEM_BYTES = 60 * 1024 * 1024      # stay under v7x's 64 MiB physical VMEM
_VMEM_SLACK_BYTES = 4 * 1024 * 1024


def _sublane_min(itemsize: int) -> int:
    # f32: 8 rows / tile; bf16: 16 (packed pairs); int8/fp8: 32.
    return {4: 8, 2: 16, 1: 32}.get(itemsize, 8)


def _fold_shape(L: int, E: int, itemsize: int):
    """Pick (rows, lane_w, folded) for folding (L, E) -> (rows, lane_w).

    lane_w is a multiple of 128 dividing L*E; lane widths are searched jointly
    with the resulting row count so rows stays sublane-aligned (tileable)."""
    total = L * E
    sub = _sublane_min(itemsize)
    candidates = [w for w in (2048, 1024, 512, 256, 128) if total % w == 0]
    if not candidates:
        return L, E, False                      # non-128-divisible fallback
    for w in candidates:                        # prefer wide + sublane-aligned rows
        rows = total // w
        if rows % sub == 0 or rows < sub:
            return rows, w, True
    w = candidates[0]                           # no aligned option: widest lane
    return total // w, w, True


def _pick_tile_rows(rows: int, lane_w: int, itemsize: int):
    """Largest sublane-aligned divisor of rows whose tile fits the byte budget.
    Returns None when rows cannot be legally tiled."""
    sub = _sublane_min(itemsize)
    if rows % sub != 0:
        return None
    cap = max(sub, (_TARGET_BLOCK_BYTES // (lane_w * itemsize)) // sub * sub)
    best = sub
    d = sub
    while d <= min(rows, cap):
        if rows % d == 0:
            best = d
        d += sub
    return best


def _pick_tile_batch(B: int, slab_bytes: int) -> int:
    """Largest divisor of B whose block stays <= the target bytes, while keeping
    at least 2 grid steps when B > 1 (feeds both v7x TensorCores)."""
    per = max(1, _TARGET_BLOCK_BYTES // max(slab_bytes, 1))
    divisors = [d for d in range(1, B + 1) if B % d == 0]
    tb = max(d for d in divisors if d <= per)
    if B > 1 and B // tb < 2:
        tb = max(d for d in divisors if d <= B // 2)
    return tb


# ---------------------------------------------------------------------------
# Forward wrapper
# ---------------------------------------------------------------------------
def positional_encoding_forward(x: jnp.ndarray, encoding: jnp.ndarray,
                                *, in_place: bool = False) -> jnp.ndarray:
    """x: (B, L, E); encoding: (max_len >= L, E). Returns x + encoding[:L]."""
    B, L, E = x.shape
    max_len, E_enc = encoding.shape
    assert E_enc == E and max_len >= L, "encoding must be (max_len >= L, E)"

    # Ideally already done once at init via prepare_positional_encoding().
    pe = encoding if max_len == L else encoding[:L]
    if pe.dtype != x.dtype:
        pe = pe.astype(x.dtype)

    itemsize = jnp.dtype(x.dtype).itemsize
    rows, lane_w, folded = _fold_shape(L, E, itemsize)

    if folded:
        x_v = x.reshape(B, rows, lane_w)        # contiguous reshape: free
        pe_v = pe.reshape(rows, lane_w)
    else:
        # TODO(synk): lane dim < 128 here -> masked stores; pad E to a multiple
        # of 128 at the model level to always hit the lane-dense path.
        x_v, pe_v = x, pe

    slab_bytes = rows * lane_w * itemsize       # one batch's folded slab

    tile_rows = None
    if slab_bytes > _TARGET_BLOCK_BYTES:
        tile_rows = _pick_tile_rows(rows, lane_w, itemsize)

    if tile_rows is not None:
        # ---- Regime B: large per-batch slab -> tile rows, batch innermost. ----
        grid = (rows // tile_rows, B)
        block_bytes = tile_rows * lane_w * itemsize
        x_spec = pl.BlockSpec((pl.Squeezed(), tile_rows, lane_w),
                              lambda r, b: (b, r, 0))
        pe_spec = pl.BlockSpec((tile_rows, lane_w), lambda r, b: (r, 0))
        o_spec = pl.BlockSpec((pl.Squeezed(), tile_rows, lane_w),
                              lambda r, b: (b, r, 0))
        kernel = _add_pe_2d_kernel
        dims = ("parallel", "arbitrary")
        vmem_need = 6 * block_bytes + _VMEM_SLACK_BYTES
    else:
        # ---- Regime A: small per-batch slab -> block across batch. -------------
        # Also the safe fallback when rows is not sublane-tileable.
        # TODO(synk): pathological shapes (huge slab, no sublane-aligned fold)
        # land here with a single whole-slab block per batch.
        tb = _pick_tile_batch(B, slab_bytes)
        grid = (B // tb,)
        block_bytes = tb * slab_bytes
        x_spec = pl.BlockSpec((tb, rows, lane_w), lambda i: (i, 0, 0))
        pe_spec = pl.BlockSpec((rows, lane_w), lambda i: (0, 0))   # resident, 1 DMA
        o_spec = pl.BlockSpec((tb, rows, lane_w), lambda i: (i, 0, 0))
        kernel = _add_pe_batched_kernel
        dims = ("parallel",)
        vmem_need = 4 * block_bytes + 2 * slab_bytes + _VMEM_SLACK_BYTES

    vmem_limit = int(min(_MAX_VMEM_BYTES, max(vmem_need, _MIN_VMEM_BYTES)))

    out = pl.pallas_call(
        kernel,
        out_shape=jax.ShapeDtypeStruct((B, rows, lane_w), x.dtype),
        grid_spec=pltpu.PrefetchScalarGridSpec(
            num_scalar_prefetch=0,
            grid=grid,
            in_specs=[x_spec, pe_spec],
            out_specs=o_spec,
        ),
        compiler_params=pltpu.CompilerParams(
            dimension_semantics=dims,
            vmem_limit_bytes=vmem_limit,
        ),
        input_output_aliases=({0: 0} if in_place else {}),
    )(x_v, pe_v)

    return out.reshape(B, L, E)


# ---------------------------------------------------------------------------
# Self test
# ---------------------------------------------------------------------------
if __name__ == "__main__":
    key = jax.random.PRNGKey(0)
    k1, k2, k3 = jax.random.split(key, 3)

    # Case 1: lane-dense, batch-blocked path (f32).
    B, L, E = 2, 8, 32
    x = jax.random.normal(k1, (B, L, E), dtype=jnp.float32)
    table = make_positional_encoding(E, max_len=16)
    pe = prepare_positional_encoding(table, L, x.dtype)          # hoisted slice+cast
    out = jax.block_until_ready(positional_encoding_forward(x, pe))
    ref = x + pe[None, :, :]
    assert out.shape == (B, L, E)
    assert jnp.allclose(out, ref, atol=1e-6), "mismatch (lane-dense path)"

    # Case 2: non-128-divisible fallback (odd embed_size), batch-blocked.
    B2, L2, E2 = 2, 8, 33
    x2 = jax.random.normal(k2, (B2, L2, E2), dtype=jnp.float32)
    table2 = make_positional_encoding(E2, max_len=L2)
    out2 = jax.block_until_ready(positional_encoding_forward(x2, table2))
    ref2 = x2 + table2[:L2][None, :, :]
    assert out2.shape == (B2, L2, E2)
    assert jnp.allclose(out2, ref2, atol=1e-6), "mismatch (fallback path)"

    # Case 3: bf16 input (dtype-aware sublane packing; PE cast once to bf16).
    B3, L3, E3 = 2, 8, 128
    x3 = jax.random.normal(k3, (B3, L3, E3), dtype=jnp.bfloat16)
    table3 = make_positional_encoding(E3, max_len=L3)
    pe3 = prepare_positional_encoding(table3, L3, x3.dtype)
    out3 = jax.block_until_ready(positional_encoding_forward(x3, pe3))
    ref3 = x3 + pe3[None, :, :]
    assert out3.shape == (B3, L3, E3)
    assert jnp.allclose(out3.astype(jnp.float32), ref3.astype(jnp.float32),
                        atol=1e-2), "mismatch (bf16 path)"

    print("KERNEL_OK")
</pallas_src>

<mosaic_0001>
module attributes {stable_mosaic.version = 11 : i64} {
  func.func @_add_pe_batched_kernel(%arg0: i32, %arg1: memref<1x1x256xf32, #tpu.memory_space<vmem>>, %arg2: memref<1x256xf32, #tpu.memory_space<vmem>>, %arg3: memref<1x1x256xf32, #tpu.memory_space<vmem>>) attributes {dimension_semantics = [#tpu.dimension_semantics<parallel>], iteration_bounds = array<i64: 2>, scalar_prefetch = 0 : i64, scratch_operands = 0 : i64, tpu.core_type = #tpu.core_type<tc>, window_params = [{transform_indices = @transform_0, window_bounds = array<i64: 1, 1, 256>}, {pipeline_mode = #tpu.pipeline_mode<synchronous>, transform_indices = @transform_1, window_bounds = array<i64: 1, 256>}, {transform_indices = @transform_2, window_bounds = array<i64: 1, 1, 256>}]} {
    %c0 = arith.constant 0 : index
    %c0_0 = arith.constant 0 : index
    %c0_1 = arith.constant 0 : index
    %0 = vector.load %arg1[%c0, %c0_0, %c0_1] : memref<1x1x256xf32, #tpu.memory_space<vmem>>, vector<1x1x256xf32>
    %c0_2 = arith.constant 0 : index
    %c0_3 = arith.constant 0 : index
    %1 = vector.load %arg2[%c0_2, %c0_3] : memref<1x256xf32, #tpu.memory_space<vmem>>, vector<1x256xf32>
    %2 = vector.shape_cast %1 : vector<1x256xf32> to vector<1x1x256xf32>
    %3 = arith.addf %0, %2 : vector<1x1x256xf32>
    %c0_4 = arith.constant 0 : index
    %c0_5 = arith.constant 0 : index
    %c0_6 = arith.constant 0 : index
    %4 = vector.load %arg3[%c0_4, %c0_5, %c0_6] : memref<1x1x256xf32, #tpu.memory_space<vmem>>, vector<1x1x256xf32>
    tpu.vector_store %arg3[%c0_4, %c0_5, %c0_6], %3 {strides = array<i32>} : memref<1x1x256xf32, #tpu.memory_space<vmem>>, vector<1x1x256xf32>,
    return
  }
  func.func @transform_0(%arg0: i32) -> (i32, i32, i32) {
    %c0_i32 = arith.constant 0 : i32
    %c0_i32_0 = arith.constant 0 : i32
    %c0_i32_1 = arith.constant 0 : i32
    return %arg0, %c0_i32, %c0_i32_0 : i32, i32, i32
  }
  func.func @transform_1(%arg0: i32) -> (i32, i32) {
    %c0_i32 = arith.constant 0 : i32
    %c0_i32_0 = arith.constant 0 : i32
    %c0_i32_1 = arith.constant 0 : i32
    return %c0_i32, %c0_i32_0 : i32, i32
  }
  func.func @transform_2(%arg0: i32) -> (i32, i32, i32) {
    %c0_i32 = arith.constant 0 : i32
    %c0_i32_0 = arith.constant 0 : i32
    %c0_i32_1 = arith.constant 0 : i32
    return %arg0, %c0_i32, %c0_i32_0 : i32, i32, i32
  }
}

</mosaic_0001>

<bundles_post_ra>
// kernel: tpu_custom_call.1
= control target key start
LH: loop header
LB: loop body
LE: loop exit
PB: predicated region body
PF: predicated region fallthrough
CT: control target
= control target key end

     0   :  { %7 = vsyncpa [#allocation3], 0  ;;  %s659_s0 = inlined_call_operand.hbm [shape: f32[2,1,256], index: 0, kind: input, shape index: {}]   ;;  %s660_s1 = inlined_call_operand.hbm [shape: f32[1,256], index: 1, kind: input, shape index: {}]   ;;  %s661_s2 = inlined_call_operand.hbm [shape: f32[2,1,256], index: 2, kind: output, shape index: {}]  }
   0x1   :  { %9 = vsyncpa [#allocation3 + $0x1], 0 }
   0x2   :  { %10 = vsyncpa [#allocation6], 0 }
   0x3   :  { %11 = vsyncpa [#allocation4], 0 }
   0x4   :  { %13 = vsyncpa [#allocation4 + $0x1], 0  ;;  %s493_s9 = smov 0   ;;  %s495_s10 = smov 0  }
   0x5   :  { %s497_s11 = smov 0   ;;  %s499_s12 = smov 0  }
   0x6 LB: > { %s514_s13 = sadd.s32 4294967295, %s473_s12   ;;  %s276_s14 = sadd.s32 4294967294, %s473_s12   ;;  %s473_s12 = sphi %s499_s12, %s684_s12   ;;  %s469_s11 = sphi %s497_s11, %s683_s11   ;;  %s465_s10 = sphi %s495_s10, %s682_s10   ;;  %s461_s9 = sphi %s493_s9, %s681_s9  }
   0x7   : > { %p39_p0 = scmp.ne.s32.totalorder %s465_s10, %s461_s9  ;;  %p662_p1 = scmp.eq.s32.totalorder %s514_s13, 0 }
   0x8   : > { %p90_p3 = scmp.eq.s32.totalorder %s276_s14, 1  ;;  %p277_p5 = scmp.ge.s32.totalorder %s473_s12, 1 }
   0x9   : > { %p523_p4 = por %p662_p1, %p39_p0  ;;  %p97_p7 = scmp.lt.s32.totalorder %s473_s12, 3 }
   0xa   : > { %p528_p6 = por %p90_p3, %p39_p0  ;;  %s475_s18 = smov [#allocation5]  }
   0xb   : > { %s666_s15 = scalar_select %p523_p4, 1, 0 }
   0xc   : > { %s667_s16 = scalar_select %p528_p6, 1, 0 }
   0xd   : > { %p533_p8 = pnand %p277_p5, %p97_p7  ;;  %s110_s19 = sshll.u32 %s475_s18, 4  ;;  %s111_s19 = int_to_ptr.vmem [resolvable:$true] %s110_s19 }
   0xe   : > { %s541_s20 = sadd.s32 1, %s473_s12   ;;  %s26_s24 = sadd.s32 1, %s469_s11 }
   0xf   : > { %s668_s17 = scalar_select %p533_p8, 1, 0 }
  0x10   : > { %p302_p10 = pneg %p533_p8  ;;  %s23_s22 = ssub.s32 %s473_s12, %s541_s20 }
  0x11   : > { %p551_p12 = scmp.eq.s32.totalorder %s23_s22, 0  ;;  %p33_p13 = scmp.ne.s32.totalorder %s469_s11, %s465_s10 }
  0x12   : > { %p545_p11 = pnand %p302_p10, %p662_p1  ;;  %s362_s25 = scalar_lea.vmem %s111_s19, 32 }
  0x13   : > { %p363_p3 = scmp.ne.s32.totalorder %s111_s19, %s362_s25  ;;  %p370_p9 = scmp.lt.s32.totalorder %s111_s19, %s111_s19 }
  0x14   : > { %p353_p0 = pneg %p545_p11  ;;  %p371_p2 = scmp.lt.s32.totalorder %s362_s25, %s362_s25 }
  0x16   : > { %p365_p5 = pnand %p363_p3, %p353_p0  ;;  %p372_p10 = por %p371_p2, %p370_p9 }
  0x18   : > { %p366_p7 = pneg %p365_p5 }
  0x1a   : > { %p373_p1 = pnand %p372_p10, %p366_p7 }
  0x1c   : > { %376 = shalt.err (!%p373_p1)
}
  0x1d   : > { %305 = dma.hbm_to_vmem [thread:$0]  (!%p545_p11), %s660_s1, 32, %s111_s19, [#allocation6]  }
  0x1e   : > { %s568_s28 = scalar_select %p551_p12, %s469_s11, %s26_s24  }
  0x1f   : > { %p34_p1 = scmp.eq.s32.totalorder %s473_s12, 0  ;;  %p671_p2 = scmp.eq.s32.totalorder %s514_s13, 1 }
  0x20   : > { %p315_p0 = scmp.lt.s32.totalorder %s473_s12, 2  ;;  %s121_s30 = sand.u32 1, %s469_s11  }
  0x21   : > { %p576_p9 = por %p671_p2, %p33_p13  ;;  %p35_p3 = por %p34_p1, %p33_p13 }
  0x22   : > { %s280_s3 = sshll.u32 %s121_s30, 1  ;;  %s292_s4 = sshll.u32 %s473_s12, 5 }
  0x23   : > { %s672_s29 = scalar_select %p576_p9, 1, 0 }
  0x24   : > { %s589_s7 = scalar_lea.hbm %s659_s0, %s292_s4  ;;  %s125_s8 = scalar_lea.vmem [#allocation2], %s280_s3 }
  0x25   : > { %s133_s14 = sshll.u32 %s125_s8, 4  ;;  %p591_p11 = pnand %p315_p0, %p35_p3  ;;  %s134_s14 = int_to_ptr.vmem [resolvable:$true] %s133_s14 }
  0x26   : > { %s122_s19 = scalar_lea.sflag [#allocation3], %s121_s30  ;;  %s377_s21 = scalar_lea.hbm %s589_s7, 32 }
  0x27   : > { %p378_p12 = scmp.ne.s32.totalorder %s589_s7, %s377_s21  ;;  %p379_p13 = pneg %p591_p11 }
  0x28   : > { %s382_s24 = scalar_lea.hbm %s659_s0, 64  ;;  %p383_p10 = scmp.lt.s32.totalorder %s589_s7, %s659_s0 }
  0x29   : > { %p380_p5 = pnand %p379_p13, %p378_p12  ;;  %p384_p1 = scmp.lt.s32.totalorder %s382_s24, %s377_s21 }
  0x2b   : > { %p381_p7 = pneg %p380_p5  ;;  %p385_p2 = por %p384_p1, %p383_p10 }
  0x2d   : > { %p386_p0 = pnand %p385_p2, %p381_p7 }
  0x2f   : > { %389 = shalt.err (!%p386_p0)
}
  0x30   : > { %s390_s27 = scalar_lea.vmem %s134_s14, 32  ;;  %s476_s30 = smov [#allocation2]  }
  0x31   : > { %p391_p3 = scmp.ne.s32.totalorder %s134_s14, %s390_s27  ;;  %s395_s3 = sshll.u32 %s476_s30, 4  ;;  %s396_s3 = int_to_ptr.vmem [resolvable:$false] %s395_s3 }
  0x32   : > { %s397_s4 = scalar_lea.vmem %s396_s3, 64  ;;  %p398_p12 = scmp.lt.s32.totalorder %s134_s14, %s396_s3 }
  0x33   : > { %p393_p6 = pnand %p391_p3, %p379_p13  ;;  %p399_p5 = scmp.lt.s32.totalorder %s397_s4, %s390_s27 }
  0x35   : > { %p394_p9 = pneg %p393_p6  ;;  %p400_p4 = por %p399_p5, %p398_p12 }
  0x37   : > { %p401_p8 = pnand %p400_p4, %p394_p9 }
  0x39   : > { %404 = shalt.err (!%p401_p8)
}
  0x3a   : > { %309 = dma.hbm_to_vmem [thread:$0]  (!%p591_p11), %s589_s7, 32, %s134_s14, %s122_s19  }
  0x3b   : > { %p674_p7 = scmp.ne.s32.totalorder %s668_s17, 0 }
  0x3c   : > { %s612_s5 = sand.u32 (!%p674_p7), 1, %s465_s10   ;;  %p675_p6 = scmp.ne.s32.totalorder (!%p674_p7), %s666_s15, 0 }
  0x3d   : > { %142 = sbr.rel (%p674_p7) target bundleno = 95 (0x5f), region = 28  ;;  %s284_s6 = sshll.u32 (!%p674_p7), %s612_s5, 1 }
  0x3e   : > { %s145_s8 = scalar_lea.sflag (!%p674_p7), [#allocation3], %s612_s5  ;;  %s148_s21 = scalar_lea.vmem (!%p674_p7), [#allocation2], %s284_s6 }
  0x42   : > { %448 = dma.done.wait (%p675_p6), %s145_s8, 32  }
  0x43   : > { %450 = vsyncadd (%p675_p6), %s145_s8, 4294967264  ;;  %p676_p4 = scmp.eq.s32.totalorder %s514_s13, 0 }
  0x45   : > { %452 = dma.done.wait (%p676_p4), [#allocation6], 32   ;;  %p677_p8 = pmov %p676_p4 }
  0x46   : > { %v176_v0 = vlaneseq  ;;  %s172_s17 = scalar_lea.vmem [#allocation7], %s284_s6  ;;  %s293_s14 = sshll.u32 %s514_s13, 5  ;;  %v173_v1 = vld [vmem:[%s148_s21] sm:$0x3]  ;;  %v174_v2 = vld [vmem:[#allocation5] sm:$0x3] }
  0x47   : > { %454 = vsyncadd (%p677_p8), [#allocation6], 4294967264  ;;  %s196_s7 = sshll.u32 %s172_s17, 4  ;;  %v175_v3 = vadd.f32 %v174_v2, %v173_v1  ;;  %s194_s19 = scalar_lea.hbm %s661_s2, %s293_s14  ;;  %s197_s7 = int_to_ptr.vmem [resolvable:$true] %s196_s7 }
  0x48   : > { %vm178_vm0 = vcmp.lt.s32.totalorder %v176_v0, 256  ;;  %s182_s22 = scalar_lea.sflag [#allocation4], %s612_s5  ;;  %s405_s23 = scalar_lea.vmem %s197_s7, 32 }
  0x49   : > { %180 = vst.msk [vmem:[%s172_s17] sm:$0x3] %vm178_vm0, %v175_v3  ;;  %p406_p9 = scmp.ne.s32.totalorder %s197_s7, %s405_s23  ;;  %p678_p11 = scmp.ne.s32.totalorder %s672_s29, 0 }
  0x4a   : > { %s477_s24 = smov [#allocation7]  }
  0x4b   : > { %p407_p13 = pnand %p406_p9, %p678_p11  ;;  %s409_s25 = sshll.u32 %s477_s24, 4  ;;  %s410_s25 = int_to_ptr.vmem [resolvable:$false] %s409_s25 }
  0x4c   : > { %s411_s13 = scalar_lea.vmem %s410_s25, 64  ;;  %p412_p1 = scmp.lt.s32.totalorder %s197_s7, %s410_s25 }
  0x4d   : > { %p408_p10 = pneg %p407_p13  ;;  %p413_p2 = scmp.lt.s32.totalorder %s411_s13, %s405_s23 }
  0x4f   : > { %p414_p0 = por %p413_p2, %p412_p1 }
  0x51   : > { %p415_p3 = pnand %p414_p0, %p408_p10 }
  0x53   : > { %418 = shalt.err (!%p415_p3)
}
  0x54   : > { %s419_s26 = scalar_lea.hbm %s194_s19, 32  ;;  %s423_s3 = scalar_lea.hbm %s661_s2, 64 }
  0x55   : > { %p420_p12 = scmp.ne.s32.totalorder %s194_s19, %s419_s26  ;;  %p424_p6 = scmp.lt.s32.totalorder %s194_s19, %s661_s2 }
  0x56   : > { %p425_p4 = scmp.lt.s32.totalorder %s423_s3, %s419_s26 }
  0x57   : > { %p421_p5 = pnand %p420_p12, %p678_p11 }
  0x58   : > { %p426_p8 = por %p425_p4, %p424_p6 }
  0x59   : > { %p422_p7 = pneg %p421_p5 }
  0x5b   : > { %p427_p9 = pnand %p426_p8, %p422_p7 }
  0x5d   : > { %430 = shalt.err (!%p427_p9)
}
  0x5e   : > { %300 = dma.vmem_to_hbm [thread:$0]  (%p678_p11), %s197_s7, 32, %s194_s19, %s182_s22  }
  0x5f PF: > { %s208_s6 = sand.u32 1, %s461_s9   ;;  %p679_p13 = scmp.ne.s32.totalorder %s667_s16, 0 }
  0x60   : > { %p680_p10 = scmp.ge.s32.totalorder %s473_s12, 2  ;;  %s209_s8 = scalar_lea.sflag [#allocation4], %s208_s6 }
  0x62   : > { %p311_p1 = pnand %p680_p10, %p679_p13 }
  0x64   : > { %p312_p2 = pneg %p311_p1 }
  0x66   : > { %456 = dma.done.wait (%p312_p2), %s209_s8, 32  }
  0x67   : > { %458 = vsyncadd (%p312_p2), %s209_s8, 4294967264  ;;  %p16_p0 = scmp.ge.s32.totalorder %s541_s20, 4   ;;  %s681_s9 = smov %s465_s10 }
  0x68   : > { %s682_s10 = smov %s469_s11  ;;  %s683_s11 = smov %s568_s28 }
  0x69   : > { %s684_s12 = smov %s541_s20  ;;  %18 = sbr.rel (!%p16_p0) target bundleno = 6 (0x6), region = 77 }
  0x6e   :  { %214 = vsyncpa [#allocation3], 1 }
  0x6f   :  { %216 = vsyncpa [#allocation3 + $0x1], 1 }
  0x70   :  { %217 = vsyncpa [#allocation6], 1 }
  0x71   :  { %218 = vsyncpa [#allocation4], 1 }
  0x72   :  { %220 = vsyncpa [#allocation4 + $0x1], 1 }

</bundles_post_ra>
